<compile_context>
chip_gen: v7x
topology: tpu7x:2x2x1
jax: 0.10.0
libtpu: 0.0.40
codegen_flags: <defaults>
</compile_context>

<pallas_src>
import math
import jax
import jax.numpy as jnp
from jax.experimental import pallas as pl
from jax.experimental.pallas import tpu as pltpu


def _pick_b_tile(B, S, W, H, vmem_budget_bytes=24 * 1024 * 1024):
    """How many batch rows to fold into one grid step."""
    def block_bytes(bt):
        x_b = bt * S * W * 2            # bf16 input block
        m_b = bt * S * S * 2            # bf16 additive mask-bias block
        o_b = bt * S * H * 4            # f32 output block
        att = bt * S * S * 4 * 2        # f32 scores + probs intermediates
        return 2 * (x_b + m_b + o_b) + att   # x2 = double buffering

    cap_rows = 1024                          # rows/step: plenty for the MXU
    bt = min(B, max(1, cap_rows // max(S, 1)))
    while bt > 1 and block_bytes(bt) > vmem_budget_bytes:
        bt -= 1
    # keep >= 2 grid steps when each half still feeds the MXU well
    # (lets Mosaic shard the parallel batch axis across v7x's 2 TensorCores)
    if B % 2 == 0 and B // bt < 2 and (B // 2) * S >= 256:
        bt = B // 2
    while B % bt != 0:
        bt -= 1
    return max(bt, 1)


def _make_kernel(b_tile, S, W, H, have_mask):
    def kernel(*refs):
        if have_mask:
            x_ref, wq_ref, bq_ref, wv_ref, bv_ref, mb_ref, o_ref = refs
        else:
            x_ref, wq_ref, bq_ref, wv_ref, bv_ref, o_ref = refs

        xb = x_ref[...]                          # (b_tile, S, W) bf16
        x2 = xb.reshape(b_tile * S, W)           # fold batch into MXU rows

        # Q' = x @ (sqrt(scale)*Wq)^T + sqrt(scale)*bq  (scale pre-folded in
        # wrapper; since the reference reuses query() for K, Q'K'^T already
        # carries the 1/sqrt(head_size) factor).
        # V  = x @ Wv^T + bv
        q2 = jnp.dot(x2, wq_ref[...],
                     preferred_element_type=jnp.float32) + bq_ref[...]
        v2 = jnp.dot(x2, wv_ref[...],
                     preferred_element_type=jnp.float32) + bv_ref[...]
        q = q2.reshape(b_tile, S, H)
        v = v2.reshape(b_tile, S, H)

        qb = q.astype(jnp.bfloat16)              # K' == Q' by construction
        att = jnp.einsum("bqd,bkd->bqk", qb, qb,
                         preferred_element_type=jnp.float32)
        if have_mask:
            att = att + mb_ref[...].astype(jnp.float32)

        # numerically stable softmax in f32
        att = att - jnp.max(att, axis=-1, keepdims=True)
        e = jnp.exp(att)
        p = e * pl.reciprocal(jnp.sum(e, axis=-1, keepdims=True), approx=True)

        out = jnp.einsum("bqk,bkd->bqd",
                         p.astype(jnp.bfloat16), v.astype(jnp.bfloat16),
                         preferred_element_type=jnp.float32)
        o_ref[...] = out.astype(o_ref.dtype)
    return kernel


def attention_head(x, wq, bq, wv, bv, head_size, mask=None, b_tile=None):
    """Pallas implementation of AttentionHead.forward.

    x    : (B, S, W)
    wq   : (H, W)  query weight (PyTorch Linear layout: out_features x in_features)
    bq   : (H,)    query bias
    wv   : (H, W)  value weight
    bv   : (H,)    value bias
    mask : optional (B, S, S); positions where mask == 0 get -inf before softmax.
    returns (B, S, H) float32
    """
    B, S, W = x.shape
    H = wq.shape[0]
    assert head_size == H
    # sqrt of the attention scale, folded into the query projection
    # (K reuses query, so the score matmul picks up the full 1/sqrt(H)).
    sqrt_scale = 1.0 / (head_size ** 0.25)

    if b_tile is None:
        b_tile = _pick_b_tile(B, S, W, H)
    assert B % b_tile == 0
    n_steps = B // b_tile

    # layout plumbing done once in the wrapper: bf16 matmul operands,
    # pre-transposed weights (W, H), f32 biases, scale folded into query
    # weight/bias, additive bf16 mask bias.
    x_bf = x.astype(jnp.bfloat16)
    wq_t = (wq.T * sqrt_scale).astype(jnp.bfloat16)
    wv_t = wv.T.astype(jnp.bfloat16)
    bq2 = (bq * sqrt_scale).reshape(1, H).astype(jnp.float32)
    bv2 = bv.reshape(1, H).astype(jnp.float32)

    have_mask = mask is not None

    in_specs = [
        pl.BlockSpec((b_tile, S, W), lambda b: (b, 0, 0)),   # x block
        pl.BlockSpec((W, H), lambda b: (0, 0)),              # scaled WqT (full)
        pl.BlockSpec((1, H), lambda b: (0, 0)),              # scaled bq
        pl.BlockSpec((W, H), lambda b: (0, 0)),              # WvT (full)
        pl.BlockSpec((1, H), lambda b: (0, 0)),              # bv
    ]
    args = [x_bf, wq_t, bq2, wv_t, bv2]
    if have_mask:
        mbias = jnp.where(mask == 0, -jnp.inf, 0.0).astype(jnp.bfloat16)
        in_specs.append(pl.BlockSpec((b_tile, S, S), lambda b: (b, 0, 0)))
        args.append(mbias)

    flops = 2 * B * S * W * H * 2 + 2 * B * S * S * H * 2
    transcendentals = B * S * S
    bytes_accessed = (x_bf.size * 2 + wq_t.size * 2 + wv_t.size * 2
                      + bq2.size * 4 + bv2.size * 4
                      + (B * S * S * 2 if have_mask else 0)
                      + B * S * H * 4)

    kernel = _make_kernel(b_tile, S, W, H, have_mask)

    return pl.pallas_call(
        kernel,
        out_shape=jax.ShapeDtypeStruct((B, S, H), jnp.float32),
        grid=(n_steps,),
        in_specs=in_specs,
        out_specs=pl.BlockSpec((b_tile, S, H), lambda b: (b, 0, 0)),
        compiler_params=pltpu.CompilerParams(
            dimension_semantics=("parallel",),
            vmem_limit_bytes=32 * 1024 * 1024),
        cost_estimate=pl.CostEstimate(
            flops=flops,
            transcendentals=transcendentals,
            bytes_accessed=bytes_accessed),
    )(*args)


def attention_head_ref(x, wq, bq, wv, bv, head_size, mask=None):
    """Plain-JAX f32 reference mirroring the PyTorch forward (for validation)."""
    q = x @ wq.T + bq
    k = x @ wq.T + bq          # reference uses query() for K too
    v = x @ wv.T + bv
    att = (q @ jnp.swapaxes(k, -2, -1)) / math.sqrt(head_size)
    if mask is not None:
        att = jnp.where(mask == 0, -jnp.inf, att)
    att = jax.nn.softmax(att, axis=-1)
    return att @ v


if __name__ == "__main__":
    B, S, W, H = 2, 8, 32, 16   # batch, seq, width, head_size

    key = jax.random.PRNGKey(0)
    kx, kwq, kbq, kwk, kbk, kwv, kbv = jax.random.split(key, 7)

    bound = 1.0 / math.sqrt(W)
    x = jax.random.normal(kx, (B, S, W), dtype=jnp.float32)
    wq = jax.random.uniform(kwq, (H, W), minval=-bound, maxval=bound, dtype=jnp.float32)
    bq = jax.random.uniform(kbq, (H,), minval=-bound, maxval=bound, dtype=jnp.float32)
    # key params exist in __init__ but forward uses query() for K; kept for parity.
    wk = jax.random.uniform(kwk, (H, W), minval=-bound, maxval=bound, dtype=jnp.float32)
    bk = jax.random.uniform(kbk, (H,), minval=-bound, maxval=bound, dtype=jnp.float32)
    wv = jax.random.uniform(kwv, (H, W), minval=-bound, maxval=bound, dtype=jnp.float32)
    bv = jax.random.uniform(kbv, (H,), minval=-bound, maxval=bound, dtype=jnp.float32)

    # --- no mask ---
    out = jax.block_until_ready(attention_head(x, wq, bq, wv, bv, head_size=H))
    ref = attention_head_ref(x, wq, bq, wv, bv, head_size=H)
    assert out.shape == (B, S, H)
    # bf16 matmul operands (f32 accumulate) -> compare with bf16-level tolerance
    assert jnp.allclose(out, ref, atol=2e-2, rtol=2e-2), \
        float(jnp.max(jnp.abs(out - ref)))

    # --- causal mask (no fully-masked rows, so no NaN rows) ---
    causal = jnp.tril(jnp.ones((S, S), dtype=jnp.int32))
    mask = jnp.broadcast_to(causal, (B, S, S))
    out_m = jax.block_until_ready(
        attention_head(x, wq, bq, wv, bv, head_size=H, mask=mask))
    ref_m = attention_head_ref(x, wq, bq, wv, bv, head_size=H, mask=mask)
    assert jnp.allclose(out_m, ref_m, atol=2e-2, rtol=2e-2), \
        float(jnp.max(jnp.abs(out_m - ref_m)))

    print("KERNEL_OK")
</pallas_src>

<mosaic_0001>
module attributes {stable_mosaic.version = 11 : i64} {
  func.func @kernel(%arg0: i32, %arg1: memref<2x8x32xbf16, #tpu.memory_space<vmem>>, %arg2: memref<32x16xbf16, #tpu.memory_space<vmem>>, %arg3: memref<1x16xf32, #tpu.memory_space<vmem>>, %arg4: memref<32x16xbf16, #tpu.memory_space<vmem>>, %arg5: memref<1x16xf32, #tpu.memory_space<vmem>>, %arg6: memref<2x8x16xf32, #tpu.memory_space<vmem>>) attributes {dimension_semantics = [#tpu.dimension_semantics<parallel>], iteration_bounds = array<i64: 1>, scalar_prefetch = 0 : i64, scratch_operands = 0 : i64, tpu.core_type = #tpu.core_type<tc>, window_params = [{transform_indices = @transform_0, window_bounds = array<i64: 2, 8, 32>}, {pipeline_mode = #tpu.pipeline_mode<synchronous>, transform_indices = @transform_1, window_bounds = array<i64: 32, 16>}, {pipeline_mode = #tpu.pipeline_mode<synchronous>, transform_indices = @transform_2, window_bounds = array<i64: 1, 16>}, {pipeline_mode = #tpu.pipeline_mode<synchronous>, transform_indices = @transform_3, window_bounds = array<i64: 32, 16>}, {pipeline_mode = #tpu.pipeline_mode<synchronous>, transform_indices = @transform_4, window_bounds = array<i64: 1, 16>}, {transform_indices = @transform_5, window_bounds = array<i64: 2, 8, 16>}]} {
    %c0 = arith.constant 0 : index
    %c0_0 = arith.constant 0 : index
    %c0_1 = arith.constant 0 : index
    %0 = vector.load %arg1[%c0, %c0_0, %c0_1] : memref<2x8x32xbf16, #tpu.memory_space<vmem>>, vector<2x8x32xbf16>
    %1 = vector.shape_cast %0 : vector<2x8x32xbf16> to vector<16x32xbf16>
    %c0_2 = arith.constant 0 : index
    %c0_3 = arith.constant 0 : index
    %2 = vector.load %arg2[%c0_2, %c0_3] : memref<32x16xbf16, #tpu.memory_space<vmem>>, vector<32x16xbf16>
    %cst = arith.constant dense<0.000000e+00> : vector<16x16xf32>
    %3 = tpu.matmul %1, %2, %cst {dimension_numbers = #tpu.dot_dimension_numbers<[1], [0], [0], [1], [0, 0, 1, 1], [], []>} : vector<16x32xbf16>, vector<32x16xbf16>, vector<16x16xf32> -> vector<16x16xf32>
    %c0_4 = arith.constant 0 : index
    %c0_5 = arith.constant 0 : index
    %4 = vector.load %arg3[%c0_4, %c0_5] : memref<1x16xf32, #tpu.memory_space<vmem>>, vector<1x16xf32>
    %5 = vector.broadcast %4 : vector<1x16xf32> to vector<16x16xf32>
    %6 = arith.addf %3, %5 : vector<16x16xf32>
    %c0_6 = arith.constant 0 : index
    %c0_7 = arith.constant 0 : index
    %7 = vector.load %arg4[%c0_6, %c0_7] : memref<32x16xbf16, #tpu.memory_space<vmem>>, vector<32x16xbf16>
    %cst_8 = arith.constant dense<0.000000e+00> : vector<16x16xf32>
    %8 = tpu.matmul %1, %7, %cst_8 {dimension_numbers = #tpu.dot_dimension_numbers<[1], [0], [0], [1], [0, 0, 1, 1], [], []>} : vector<16x32xbf16>, vector<32x16xbf16>, vector<16x16xf32> -> vector<16x16xf32>
    %c0_9 = arith.constant 0 : index
    %c0_10 = arith.constant 0 : index
    %9 = vector.load %arg5[%c0_9, %c0_10] : memref<1x16xf32, #tpu.memory_space<vmem>>, vector<1x16xf32>
    %10 = vector.broadcast %9 : vector<1x16xf32> to vector<16x16xf32>
    %11 = arith.addf %8, %10 : vector<16x16xf32>
    %12 = vector.shape_cast %6 : vector<16x16xf32> to vector<2x8x16xf32>
    %13 = vector.shape_cast %11 : vector<16x16xf32> to vector<2x8x16xf32>
    %14 = arith.truncf %12 : vector<2x8x16xf32> to vector<2x8x16xbf16>
    "tpu.trace_start"() <{level = 10 : i32, message = "bqd,bkd->bqk"}> : () -> ()
    %cst_11 = arith.constant dense<0.000000e+00> : vector<2x8x8xf32>
    %15 = tpu.matmul %14, %14, %cst_11 {dimension_numbers = #tpu.dot_dimension_numbers<[2], [2], [1], [1], [0, 0, 0, 1, 1, 1], [0], [0]>} : vector<2x8x16xbf16>, vector<2x8x16xbf16>, vector<2x8x8xf32> -> vector<2x8x8xf32>
    "tpu.trace_stop"() : () -> ()
    %cst_12 = arith.constant dense<0xFF800000> : vector<2x8xf32>
    %16 = vector.multi_reduction <maximumf>, %15, %cst_12 [2] : vector<2x8x8xf32> to vector<2x8xf32>
    %17 = vector.shape_cast %16 : vector<2x8xf32> to vector<2x8x1xf32>
    %18 = vector.broadcast %17 : vector<2x8x1xf32> to vector<2x8x8xf32>
    %19 = arith.subf %15, %18 : vector<2x8x8xf32>
    %20 = math.exp %19 : vector<2x8x8xf32>
    %cst_13 = arith.constant dense<0.000000e+00> : vector<2x8xf32>
    %21 = vector.multi_reduction <add>, %20, %cst_13 [2] : vector<2x8x8xf32> to vector<2x8xf32>
    %22 = vector.shape_cast %21 : vector<2x8xf32> to vector<2x8x1xf32>
    %23 = tpu.reciprocal %22 {approx = true} : vector<2x8x1xf32> -> vector<2x8x1xf32>
    %24 = vector.broadcast %23 : vector<2x8x1xf32> to vector<2x8x8xf32>
    %25 = arith.mulf %20, %24 : vector<2x8x8xf32>
    %26 = arith.truncf %25 : vector<2x8x8xf32> to vector<2x8x8xbf16>
    %27 = arith.truncf %13 : vector<2x8x16xf32> to vector<2x8x16xbf16>
    "tpu.trace_start"() <{level = 10 : i32, message = "bqk,bkd->bqd"}> : () -> ()
    %cst_14 = arith.constant dense<0.000000e+00> : vector<2x8x16xf32>
    %28 = tpu.matmul %26, %27, %cst_14 {dimension_numbers = #tpu.dot_dimension_numbers<[2], [1], [1], [2], [0, 0, 0, 1, 1, 2], [0], [0]>} : vector<2x8x8xbf16>, vector<2x8x16xbf16>, vector<2x8x16xf32> -> vector<2x8x16xf32>
    "tpu.trace_stop"() : () -> ()
    %c0_15 = arith.constant 0 : index
    %c0_16 = arith.constant 0 : index
    %c0_17 = arith.constant 0 : index
    %29 = vector.load %arg6[%c0_15, %c0_16, %c0_17] : memref<2x8x16xf32, #tpu.memory_space<vmem>>, vector<2x8x16xf32>
    tpu.vector_store %arg6[%c0_15, %c0_16, %c0_17], %28 {strides = array<i32>} : memref<2x8x16xf32, #tpu.memory_space<vmem>>, vector<2x8x16xf32>,
    return
  }
  func.func @transform_0(%arg0: i32) -> (i32, i32, i32) {
    %c0_i32 = arith.constant 0 : i32
    %c0_i32_0 = arith.constant 0 : i32
    %c0_i32_1 = arith.constant 0 : i32
    return %arg0, %c0_i32, %c0_i32_0 : i32, i32, i32
  }
  func.func @transform_1(%arg0: i32) -> (i32, i32) {
    %c0_i32 = arith.constant 0 : i32
    %c0_i32_0 = arith.constant 0 : i32
    %c0_i32_1 = arith.constant 0 : i32
    return %c0_i32, %c0_i32_0 : i32, i32
  }
  func.func @transform_2(%arg0: i32) -> (i32, i32) {
    %c0_i32 = arith.constant 0 : i32
    %c0_i32_0 = arith.constant 0 : i32
    %c0_i32_1 = arith.constant 0 : i32
    return %c0_i32, %c0_i32_0 : i32, i32
  }
  func.func @transform_3(%arg0: i32) -> (i32, i32) {
    %c0_i32 = arith.constant 0 : i32
    %c0_i32_0 = arith.constant 0 : i32
    %c0_i32_1 = arith.constant 0 : i32
    return %c0_i32, %c0_i32_0 : i32, i32
  }
  func.func @transform_4(%arg0: i32) -> (i32, i32) {
    %c0_i32 = arith.constant 0 : i32
    %c0_i32_0 = arith.constant 0 : i32
    %c0_i32_1 = arith.constant 0 : i32
    return %c0_i32, %c0_i32_0 : i32, i32
  }
  func.func @transform_5(%arg0: i32) -> (i32, i32, i32) {
    %c0_i32 = arith.constant 0 : i32
    %c0_i32_0 = arith.constant 0 : i32
    %c0_i32_1 = arith.constant 0 : i32
    return %arg0, %c0_i32, %c0_i32_0 : i32, i32, i32
  }
}

</mosaic_0001>

<bundles_post_ra>
// kernel: tpu_custom_call.1
= control target key start
LH: loop header
LB: loop body
LE: loop exit
PB: predicated region body
PF: predicated region fallthrough
CT: control target
= control target key end

     0   :  { %v497_v1 = vmov 0.0   ;;  %vm498_vm0 = vmmov 0   ;;  %s583_s0 = inlined_call_operand.vmem [shape: bf16[2,8,32], index: 0, kind: input, shape index: {}]   ;;  %s584_s1 = inlined_call_operand.vmem [shape: bf16[32,16], index: 1, kind: input, shape index: {}]   ;;  %s585_s2 = inlined_call_operand.vmem [shape: f32[1,16], index: 2, kind: input, shape index: {}]   ;;  %s586_s3 = inlined_call_operand.vmem [shape: bf16[32,16], index: 3, kind: input, shape index: {}]   ;;  %s587_s4 = inlined_call_operand.vmem [shape: f32[1,16], index: 4, kind: input, shape index: {}]   ;;  %s588_s5 = inlined_call_operand.hbm [shape: f32[2,8,16], index: 5, kind: output, shape index: {}]  }
   0x1   :  { %v460_v0 = vld [vmem:[%s584_s1] sm:$0xff]   ;;  %415 = vmatprep.subr.bf16.mxu0 %v497_v1  ;;  %423 = vmatprep.subr.bf16.mxu1 %v497_v1  ;;  %v461_v2 = vld [vmem:[%s584_s1 + $0x8] sm:$0xff]  }
   0x2   :  { %416 = vmatpush3.bf16.msra.mxu0 %v460_v0  ;;  %419 = vmatprep.mubr.msk.bf16.mxu0 %vm498_vm0, %v497_v1  ;;  %v463_v3 = vld [vmem:[%s586_s3] sm:$0xff]   ;;  %v464_v5 = vld [vmem:[%s586_s3 + $0x8] sm:$0xff]  }
   0x3   :  { %417 = vmatprep.subr.bf16.mxu0 %v497_v1  ;;  %427 = vmatprep.mubr.msk.bf16.mxu1 %vm498_vm0, %v497_v1  ;;  %v462_v4 = vld [vmem:[%s583_s0] sm:$0xff]  }
   0x4   :  { %424 = vmatpush3.bf16.msra.mxu1 %v463_v3 }
   0x5   :  { %10 = vsyncpa [#allocation3], 0  ;;  %vm52_vm1 = vcmask 261120   ;;  %425 = vmatprep.subr.bf16.mxu1 %v497_v1  ;;  %v388_v6 = vld [vmem:[%s585_s2] ss:$0 sm:$0xff]  ;;  %vm163_vm2 = vcmask 130048  }
   0x6   :  { %418 = vmatpush3.bf16.msra.mxu0 %v461_v2  ;;  %v393_v10 = vld [vmem:[%s587_s4] ss:$0 sm:$0xff]  ;;  %vm280_vm3 = vcmask 1043456   ;;  %vm250_vm4 = vcmask 64512   ;;  %s499_s2 = smov [#allocation2]  }
   0x7   :  { %431 = vmatprep.subr.bf16.mxu0 %v497_v1  ;;  %s377_s4 = sshll.u32 %s499_s2, 4  ;;  %s378_s4 = int_to_ptr.vmem [resolvable:$true] %s377_s4 }
   0x8   :  { %426 = vmatpush3.bf16.msra.mxu1 %v464_v5  ;;  %s473_s29 = scalar_lea.vmem %s378_s4, 256  ;;  %p478_p1 = scmp.lt.s32.totalorder %s378_s4, %s378_s4 }
   0x9   :  { %420 = vmatmul.mubr.msk.bf16.vlgmr.msra.gmra.mrb[0].mxu0 %vm52_vm1, %v462_v4  ;;  %437 = vmatprep.subr.bf16.mxu1 %v497_v1  ;;  %p474_p0 = scmp.ne.s32.totalorder %s378_s4, %s473_s29  ;;  %p479_p2 = scmp.lt.s32.totalorder %s473_s29, %s473_s29 }
   0xa   :  { %433 = vmatprep.mubr.msk.bf16.mxu0 %vm498_vm0, %v497_v1 }
   0xb   :  { %428 = vmatmul.mubr.msk.bf16.vlgmr.msra.gmra.mrb[0].mxu1 %vm52_vm1, %v462_v4  ;;  %p480_p3 = por %p479_p2, %p478_p1 }
   0xc   :  { %439 = vmatprep.mubr.msk.bf16.mxu1 %vm498_vm0, %v497_v1 }
   0xd   :  { %p481_p4 = pnand %p480_p3, %p474_p0 }
  0xdc   :  { %v90_v7 = vpop.f32.mrb[0].mxu0 }
  0xdd   :  { %v91_v8 = vadd.f32 %v388_v6, %v90_v7  ;;  %v421_v9 = vpop.f32.mrb[1].mxu0 }
  0xde   :  { %v93_v11 = vpop.f32.mrb[2].mxu0  ;;  %v154_v15 = vpop.f32.mrb[0].mxu1 }
  0xdf   :  { %v161_v12 = vpack.c.bf16 %v91_v8, %v91_v8  ;;  %v94_v13 = vadd.f32 %v388_v6, %v93_v11  ;;  %v422_v14 = vpop.f32.mrb[3].mxu0  ;;  %v155_v16 = vadd.f32 %v393_v10, %v154_v15  ;;  %v429_v17 = vpop.f32.mrb[1].mxu1 }
  0xe0   :  { %v157_v20 = vpop.f32.mrb[2].mxu1 }
  0xe1   :  { %v165_v18 = vsel %vm163_vm2, %v161_v12, 0  ;;  %v162_v19 = vpack.c.bf16 %v94_v13, %v94_v13  ;;  %v158_v21 = vadd.f32 %v393_v10, %v157_v20  ;;  %v430_v22 = vpop.f32.mrb[3].mxu1  ;;  %v275_v24 = vpack.c.bf16 %v155_v16, %v155_v16 }
  0xe2   :  { %432 = vmatpush3.bf16.xpose.msra.mxu0 %v165_v18 }
  0xe3   :  { %v208_v23 = vsel %vm163_vm2, %v162_v19, 0  ;;  %443 = vmatprep.subr.bf16.mxu0 %v497_v1  ;;  %v276_v25 = vpack.c.bf16 %v158_v21, %v158_v21  ;;  %v282_v26 = vsel %vm280_vm3, %v275_v24, 0 }
  0xe4   :  { %438 = vmatpush3.bf16.xpose.msra.mxu1 %v208_v23 }
  0xe5   :  { %449 = vmatprep.subr.bf16.mxu1 %v497_v1  ;;  %v328_v27 = vsel %vm280_vm3, %v276_v25, 0 }
  0xe9   :  { %434 = vmatmul.mubr.msk.bf16.vlgmr.msra.gmra.mrb[4].mxu0 %vm163_vm2, %v161_v12 }
  0xea   :  { %444 = vmatpush3.bf16.msra.mxu0 %v282_v26  ;;  %445 = vmatprep.mubr.msk.bf16.mxu0 %vm498_vm0, %v497_v1 }
  0xeb   :  { %440 = vmatmul.mubr.msk.bf16.vlgmr.msra.gmra.mrb[4].mxu1 %vm163_vm2, %v162_v19 }
  0xec   :  { %450 = vmatpush3.bf16.msra.mxu1 %v328_v27  ;;  %451 = vmatprep.mubr.msk.bf16.mxu1 %vm498_vm0, %v497_v1 }
 0x1bc   :  { %v201_v28 = vpop.f32.mrb[4].mxu0 }
 0x1bd   :  { %v435_v29 = vpop.f32.mrb[5].mxu0  ;;  %v251_v30 = vsel %vm250_vm4, %v201_v28, -inf }
 0x1be   :  { %v244_v31 = vpop.f32.mrb[4].mxu1  ;;  %252 = vmax.xlane.f32.xlu0 %v251_v30  ;;  %v204_v32 = vpop.f32.mrb[6].mxu0 }
 0x1bf   :  { %v436_v33 = vpop.f32.mrb[7].mxu0  ;;  %v441_v34 = vpop.f32.mrb[5].mxu1  ;;  %v254_v37 = vsel %vm250_vm4, %v244_v31, -inf }
 0x1c0   :  { %v247_v35 = vpop.f32.mrb[6].mxu1 }
 0x1c1   :  { %v442_v36 = vpop.f32.mrb[7].mxu1 }
 0x1c2   :  { %255 = vmax.xlane.f32.xlu0 %v254_v37 }
 0x24b   :  { %v253_v38 = vpop.xlane.xlu0 %252 }
 0x24c   :  { %v257_v39 = vsub.f32 %v201_v28, %v253_v38 }
 0x24e   :  { %v259_v40 = vmul.f32 1.442695, %v257_v39 }
 0x24f   :  { %v256_v41 = vpop.xlane.xlu0 %255 }
 0x250   :  { %465 = vpow2.f32 %v259_v40  ;;  %v258_v42 = vsub.f32 %v244_v31, %v256_v41 }
 0x252   :  { %v261_v43 = vmul.f32 1.442695, %v258_v42 }
 0x254   :  { %467 = vpow2.f32 %v261_v43 }
 0x25a   :  { %v466_v44 = vpop.eup %465 }
 0x25b   :  { %v263_v45 = vsel %vm250_vm4, %v466_v44, 0.0 }
 0x25c   :  { %264 = vadd.xlane.f32.xlu1 %v263_v45 }
 0x25e   :  { %v468_v46 = vpop.eup %467 }
 0x25f   :  { %v266_v47 = vsel %vm250_vm4, %v468_v46, 0.0 }
 0x260   :  { %267 = vadd.xlane.f32.xlu1 %v266_v47 }
 0x2e9   :  { %v265_v48 = vpop.xlane.xlu1 %264 }
 0x2ea   :  { %469 = vrcp.f32 %v265_v48 }
 0x2ed   :  { %v268_v49 = vpop.xlane.xlu1 %267 }
 0x2ee   :  { %471 = vrcp.f32 %v268_v49 }
 0x2f4   :  { %v470_v50 = vpop.eup %469 }
 0x2f5   :  { %v271_v51 = vmul.f32 %v470_v50, %v466_v44 }
 0x2f7   :  { %v273_v52 = vpack.c.bf16 %v271_v51, %v271_v51 }
 0x2f8   :  { %v472_v53 = vpop.eup %471 }
 0x2f9   :  { %v272_v54 = vmul.f32 %v472_v53, %v468_v46  ;;  %446 = vmatmul.mubr.msk.bf16.vlgmr.msra.gmra.mrb[8].mxu0 %vm250_vm4, %v273_v52 }
 0x2fb   :  { %v274_v55 = vpack.c.bf16 %v272_v54, %v272_v54 }
 0x2fd   :  { %452 = vmatmul.mubr.msk.bf16.vlgmr.msra.gmra.mrb[8].mxu1 %vm250_vm4, %v274_v55 }
 0x3cc   :  { %v318_v56 = vpop.f32.mrb[8].mxu0 }
 0x3cd   :  { %370 = vst.msk [vmem:[#allocation2] sm:$0xff] %vm163_vm2, %v318_v56  ;;  %v447_v57 = vpop.f32.mrb[9].mxu0 }
 0x3ce   :  { %v321_v58 = vpop.f32.mrb[10].mxu0 }
 0x3cf   :  { %v448_v59 = vpop.f32.mrb[11].mxu0 }
 0x3d0   :  { %v364_v60 = vpop.f32.mrb[8].mxu1 }
 0x3d1   :  { %371 = vst.msk [vmem:[#allocation2 + $0x8] sm:$0xff] %vm163_vm2, %v364_v60  ;;  %v453_v61 = vpop.f32.mrb[9].mxu1 }
 0x3d2   :  { %v367_v62 = vpop.f32.mrb[10].mxu1 }
 0x3d3   :  { %484 = shalt.err (!%p481_p4)
}
 0x3d4   :  { %s485_s7 = scalar_lea.hbm %s588_s5, 256 }
 0x3d5   :  { %p486_p5 = scmp.ne.s32.totalorder %s588_s5, %s485_s7  ;;  %p489_p6 = scmp.lt.u32.totalorder %s485_s7, %s588_s5 }
 0x3d7   :  { %p491_p7 = pnand %p489_p6, %p486_p5 }
 0x3d9   :  { %494 = shalt.err (!%p491_p7)
}
 0x3da   :  { %s500_s12 = smov 128   ;;  %s501_s13 = smov 8   ;;  %v454_v63 = vpop.f32.mrb[11].mxu1 }
 0x3db   :  { %383 = dma.vmem_to_hbm [thread:$0]  %s378_s4, 256, %s588_s5, [#allocation3], %s500_s12, %s500_s12, %s501_s13  }
 0x3dc   :  { %495 = dma.done.wait [#allocation3], 256  }
 0x3dd   :  { %496 = vsyncadd [#allocation3], 4294967040 }
 0x3de   :  { %387 = vsyncpa [#allocation3], 1 }

</bundles_post_ra>
